<compile_context>
chip_gen: v7x
topology: tpu7x:2x2x1
jax: 0.10.0
libtpu: 0.0.40
codegen_flags: <defaults>
</compile_context>

<pallas_src>
import functools

import jax
import jax.numpy as jnp
from jax.experimental import pallas as pl
from jax.experimental.pallas import tpu as pltpu


# ---------------------------------------------------------------------------
# Kernel
# ---------------------------------------------------------------------------
def _attention_kernel(q_ref, c_ref, win_ref, wom_ref, woq_ref, out_ref, wts_ref,
                      *, approx_recip):
    # q_ref  : (Ot, D)  query tile for the current batch element (f32, cast to bf16 here)
    # c_ref  : (Q,  D)  full context for the current batch element
    # win_ref: (D, D)  = W_in^T           (bf16, pre-transposed in the wrapper)
    # wom_ref: (D, D)  = W_out[:, :D]^T   (multiplies mix)
    # woq_ref: (D, D)  = W_out[:, D:]^T   (multiplies the transformed query)
    q = q_ref[...].astype(jnp.bfloat16)                      # (Ot, D)
    c = c_ref[...].astype(jnp.bfloat16)                      # (Q,  D)
    win = win_ref[...]
    wom = wom_ref[...]
    woq = woq_ref[...]

    # linear_in (attention_type == 'general'):  q @ W_in^T
    qt = jnp.dot(q, win, preferred_element_type=jnp.float32)  # (Ot, D) f32
    qt_b = qt.astype(jnp.bfloat16)

    # scores = bmm(query, context^T): contract D of both operands directly,
    # no (Q, D) -> (D, Q) transpose of the context tile is materialized.
    scores = jax.lax.dot_general(
        qt_b, c, (((1,), (1,)), ((), ())),
        preferred_element_type=jnp.float32)                   # (Ot, Q) f32

    # softmax over query_len, f32 (exp + reciprocal on the EUP).
    m = jnp.max(scores, axis=-1, keepdims=True)
    e = jnp.exp(scores - m)
    denom = jnp.sum(e, axis=-1, keepdims=True)
    weights = e * pl.reciprocal(denom, approx=approx_recip)   # (Ot, Q) f32

    # mix = bmm(weights, context)
    mix = jnp.dot(weights.astype(jnp.bfloat16), c,
                  preferred_element_type=jnp.float32)         # (Ot, D) f32

    # output = tanh(cat([mix, query]) @ W_out^T)
    #        = tanh(mix @ W_out[:, :D]^T + query @ W_out[:, D:]^T)
    out = jnp.dot(mix.astype(jnp.bfloat16), wom, preferred_element_type=jnp.float32)
    out = out + jnp.dot(qt_b, woq, preferred_element_type=jnp.float32)
    out = jnp.tanh(out)                                       # f32

    out_ref[...] = out.astype(out_ref.dtype)
    wts_ref[...] = weights.astype(wts_ref.dtype)


# ---------------------------------------------------------------------------
# Block-size heuristic
# ---------------------------------------------------------------------------
def _choose_o_block(O, target=128):
    """O tile: full O when small, else the largest divisor of O <= target that is a
    multiple of 8 (the (8,128) tiling rule requires divisibility by 8 or the full dim)."""
    if O <= target:
        return O
    for cand in range(target, 7, -1):
        if O % cand == 0 and cand % 8 == 0:
            return cand
    return O


# ---------------------------------------------------------------------------
# Wrapper
# ---------------------------------------------------------------------------
def attention_pallas(query, context, w_in, w_out, *, approx_recip=True,
                     weight_dtype=jnp.bfloat16):
    """query: [B,O,D], context: [B,Q,D], w_in: [D,D], w_out: [D,2D].
    Returns (output [B,O,D], attention_weights [B,O,Q])."""
    B, O, D = query.shape
    Q = context.shape[1]
    assert context.shape == (B, Q, D)
    assert w_in.shape == (D, D) and w_out.shape == (D, 2 * D)

    # Pre-transpose ONCE in XLA so the MXU consumes [K, N] weights directly
    # (no per-grid-step XLU transpose), and store them bf16 to halve weight
    # DMA / VMEM footprint.  f32 accumulation in-kernel keeps accuracy.
    win_t = w_in.T.astype(weight_dtype)            # (D, D): x @ win_t == linear_in(x)
    wom_t = w_out[:, :D].T.astype(weight_dtype)    # multiplies mix
    woq_t = w_out[:, D:].T.astype(weight_dtype)    # multiplies transformed query

    block_o = _choose_o_block(O)
    grid = (B, O // block_o)

    out_shapes = (
        jax.ShapeDtypeStruct((B, O, D), query.dtype),
        jax.ShapeDtypeStruct((B, O, Q), query.dtype),
    )

    grid_spec = pltpu.PrefetchScalarGridSpec(
        num_scalar_prefetch=0,
        grid=grid,
        in_specs=[
            # Batch dim squeezed out of every tile -> kernel sees 2-D refs.
            pl.BlockSpec((None, block_o, D), lambda b, o: (b, o, 0)),  # query
            pl.BlockSpec((None, Q, D),       lambda b, o: (b, 0, 0)),  # context (per-batch)
            # Grid-invariant weights (DMA'd once, stay resident in VMEM).
            pl.BlockSpec((D, D), lambda b, o: (0, 0)),                 # W_in^T
            pl.BlockSpec((D, D), lambda b, o: (0, 0)),                 # W_out[:, :D]^T
            pl.BlockSpec((D, D), lambda b, o: (0, 0)),                 # W_out[:, D:]^T
        ],
        out_specs=[
            pl.BlockSpec((None, block_o, D), lambda b, o: (b, o, 0)),  # output
            pl.BlockSpec((None, block_o, Q), lambda b, o: (b, o, 0)),  # weights
        ],
    )

    kernel = functools.partial(_attention_kernel, approx_recip=approx_recip)

    return pl.pallas_call(
        kernel,
        out_shape=out_shapes,
        grid_spec=grid_spec,
        compiler_params=pltpu.CompilerParams(
            dimension_semantics=("parallel", "parallel")),
    )(query, context, win_t, wom_t, woq_t)


# ---------------------------------------------------------------------------
# References
# ---------------------------------------------------------------------------
def attention_reference(query, context, w_in, w_out):
    """Exact f32 pure-JAX reference matching the PyTorch forward."""
    hp = jax.lax.Precision.HIGHEST
    q = jnp.einsum('bod,ed->boe', query, w_in, precision=hp)          # linear_in
    scores = jnp.einsum('bod,bqd->boq', q, context, precision=hp)     # bmm
    weights = jax.nn.softmax(scores, axis=-1)
    mix = jnp.einsum('boq,bqd->bod', weights, context, precision=hp)  # bmm
    combined = jnp.concatenate([mix, q], axis=-1)                     # [B,O,2D]
    out = jnp.tanh(jnp.einsum('boc,dc->bod', combined, w_out, precision=hp))
    return out, weights


def attention_reference_matched(query, context, w_in, w_out):
    """Same math with matmul inputs rounded to bf16 exactly as in the kernel
    (f32 accumulation), so the kernel can be checked tightly."""
    D = query.shape[-1]
    hp = jax.lax.Precision.HIGHEST
    b = lambda x: x.astype(jnp.bfloat16).astype(jnp.float32)
    q, c = b(query), b(context)
    win_t, wom_t, woq_t = b(w_in.T), b(w_out[:, :D].T), b(w_out[:, D:].T)
    qt = jnp.einsum('bod,de->boe', q, win_t, precision=hp)
    qt_b = b(qt)
    scores = jnp.einsum('bod,bqd->boq', qt_b, c, precision=hp)
    weights = jax.nn.softmax(scores, axis=-1)
    mix = jnp.einsum('boq,bqd->bod', b(weights), c, precision=hp)
    out = jnp.tanh(jnp.einsum('bod,de->boe', b(mix), wom_t, precision=hp)
                   + jnp.einsum('bod,de->boe', qt_b, woq_t, precision=hp))
    return out, weights


# ---------------------------------------------------------------------------
# Demo / self-test
# ---------------------------------------------------------------------------
if __name__ == "__main__":
    B, O, Q, D = 2, 4, 8, 32   # batch, output_len, query_len, dimensions

    key = jax.random.PRNGKey(0)
    k1, k2, k3, k4 = jax.random.split(key, 4)

    query   = jax.random.normal(k1, (B, O, D), dtype=jnp.float32)
    context = jax.random.normal(k2, (B, Q, D), dtype=jnp.float32)
    # deterministic init, matches nn.Linear weight shapes
    w_in  = jax.random.normal(k3, (D, D),     dtype=jnp.float32) * (1.0 / jnp.sqrt(D))
    w_out = jax.random.normal(k4, (D, 2 * D), dtype=jnp.float32) * (1.0 / jnp.sqrt(2 * D))

    out, weights = attention_pallas(query, context, w_in, w_out)
    jax.block_until_ready((out, weights))

    assert out.shape == (B, O, D) and weights.shape == (B, O, Q)
    assert out.dtype == query.dtype and weights.dtype == query.dtype

    # Tight check against the bf16-matmul-precision reference. Tolerances cover the
    # approx EUP reciprocal (~2^-12 relative) and benign accumulation-order effects.
    out_m, w_m = attention_reference_matched(query, context, w_in, w_out)
    assert jnp.allclose(weights, w_m, atol=1e-2), float(jnp.max(jnp.abs(weights - w_m)))
    assert jnp.allclose(out, out_m, atol=2e-2), float(jnp.max(jnp.abs(out - out_m)))

    # Loose sanity check against the exact f32 forward pass (bf16-input precision).
    out_f, w_f = attention_reference(query, context, w_in, w_out)
    assert jnp.allclose(weights, w_f, atol=5e-2), float(jnp.max(jnp.abs(weights - w_f)))
    assert jnp.allclose(out, out_f, atol=1e-1), float(jnp.max(jnp.abs(out - out_f)))

    print("KERNEL_OK")
</pallas_src>

<mosaic_0001>
module attributes {stable_mosaic.version = 11 : i64} {
  func.func @_attention_kernel(%arg0: i32, %arg1: i32, %arg2: memref<1x4x32xf32, #tpu.memory_space<vmem>>, %arg3: memref<1x8x32xf32, #tpu.memory_space<vmem>>, %arg4: memref<32x32xbf16, #tpu.memory_space<vmem>>, %arg5: memref<32x32xbf16, #tpu.memory_space<vmem>>, %arg6: memref<32x32xbf16, #tpu.memory_space<vmem>>, %arg7: memref<1x4x32xf32, #tpu.memory_space<vmem>>, %arg8: memref<1x4x8xf32, #tpu.memory_space<vmem>>) attributes {dimension_semantics = [#tpu.dimension_semantics<parallel>, #tpu.dimension_semantics<parallel>], iteration_bounds = array<i64: 2, 1>, scalar_prefetch = 0 : i64, scratch_operands = 0 : i64, tpu.core_type = #tpu.core_type<tc>, window_params = [{transform_indices = @transform_0, window_bounds = array<i64: 1, 4, 32>}, {transform_indices = @transform_1, window_bounds = array<i64: 1, 8, 32>}, {pipeline_mode = #tpu.pipeline_mode<synchronous>, transform_indices = @transform_2, window_bounds = array<i64: 32, 32>}, {pipeline_mode = #tpu.pipeline_mode<synchronous>, transform_indices = @transform_3, window_bounds = array<i64: 32, 32>}, {pipeline_mode = #tpu.pipeline_mode<synchronous>, transform_indices = @transform_4, window_bounds = array<i64: 32, 32>}, {transform_indices = @transform_5, window_bounds = array<i64: 1, 4, 32>}, {transform_indices = @transform_6, window_bounds = array<i64: 1, 4, 8>}]} {
    %c0 = arith.constant 0 : index
    %c0_0 = arith.constant 0 : index
    %c0_1 = arith.constant 0 : index
    %0 = vector.load %arg2[%c0, %c0_0, %c0_1] : memref<1x4x32xf32, #tpu.memory_space<vmem>>, vector<1x4x32xf32>
    %1 = vector.shape_cast %0 : vector<1x4x32xf32> to vector<4x32xf32>
    %2 = arith.truncf %1 : vector<4x32xf32> to vector<4x32xbf16>
    %c0_2 = arith.constant 0 : index
    %c0_3 = arith.constant 0 : index
    %c0_4 = arith.constant 0 : index
    %3 = vector.load %arg3[%c0_2, %c0_3, %c0_4] : memref<1x8x32xf32, #tpu.memory_space<vmem>>, vector<1x8x32xf32>
    %4 = vector.shape_cast %3 : vector<1x8x32xf32> to vector<8x32xf32>
    %5 = arith.truncf %4 : vector<8x32xf32> to vector<8x32xbf16>
    %c0_5 = arith.constant 0 : index
    %c0_6 = arith.constant 0 : index
    %6 = vector.load %arg4[%c0_5, %c0_6] : memref<32x32xbf16, #tpu.memory_space<vmem>>, vector<32x32xbf16>
    %c0_7 = arith.constant 0 : index
    %c0_8 = arith.constant 0 : index
    %7 = vector.load %arg5[%c0_7, %c0_8] : memref<32x32xbf16, #tpu.memory_space<vmem>>, vector<32x32xbf16>
    %c0_9 = arith.constant 0 : index
    %c0_10 = arith.constant 0 : index
    %8 = vector.load %arg6[%c0_9, %c0_10] : memref<32x32xbf16, #tpu.memory_space<vmem>>, vector<32x32xbf16>
    %cst = arith.constant dense<0.000000e+00> : vector<4x32xf32>
    %9 = tpu.matmul %2, %6, %cst {dimension_numbers = #tpu.dot_dimension_numbers<[1], [0], [0], [1], [0, 0, 1, 1], [], []>} : vector<4x32xbf16>, vector<32x32xbf16>, vector<4x32xf32> -> vector<4x32xf32>
    %10 = arith.truncf %9 : vector<4x32xf32> to vector<4x32xbf16>
    %cst_11 = arith.constant dense<0.000000e+00> : vector<4x8xf32>
    %11 = tpu.matmul %10, %5, %cst_11 {dimension_numbers = #tpu.dot_dimension_numbers<[1], [1], [0], [0], [0, 0, 1, 0], [], []>} : vector<4x32xbf16>, vector<8x32xbf16>, vector<4x8xf32> -> vector<4x8xf32>
    %cst_12 = arith.constant dense<0xFF800000> : vector<4xf32>
    %12 = vector.multi_reduction <maximumf>, %11, %cst_12 [1] : vector<4x8xf32> to vector<4xf32>
    %13 = vector.shape_cast %12 : vector<4xf32> to vector<4x1xf32>
    %14 = vector.broadcast %13 : vector<4x1xf32> to vector<4x8xf32>
    %15 = arith.subf %11, %14 : vector<4x8xf32>
    %16 = math.exp %15 : vector<4x8xf32>
    %cst_13 = arith.constant dense<0.000000e+00> : vector<4xf32>
    %17 = vector.multi_reduction <add>, %16, %cst_13 [1] : vector<4x8xf32> to vector<4xf32>
    %18 = vector.shape_cast %17 : vector<4xf32> to vector<4x1xf32>
    %19 = tpu.reciprocal %18 {approx = true} : vector<4x1xf32> -> vector<4x1xf32>
    %20 = vector.broadcast %19 : vector<4x1xf32> to vector<4x8xf32>
    %21 = arith.mulf %16, %20 : vector<4x8xf32>
    %22 = arith.truncf %21 : vector<4x8xf32> to vector<4x8xbf16>
    %cst_14 = arith.constant dense<0.000000e+00> : vector<4x32xf32>
    %23 = tpu.matmul %22, %5, %cst_14 {dimension_numbers = #tpu.dot_dimension_numbers<[1], [0], [0], [1], [0, 0, 1, 1], [], []>} : vector<4x8xbf16>, vector<8x32xbf16>, vector<4x32xf32> -> vector<4x32xf32>
    %24 = arith.truncf %23 : vector<4x32xf32> to vector<4x32xbf16>
    %cst_15 = arith.constant dense<0.000000e+00> : vector<4x32xf32>
    %25 = tpu.matmul %24, %7, %cst_15 {dimension_numbers = #tpu.dot_dimension_numbers<[1], [0], [0], [1], [0, 0, 1, 1], [], []>} : vector<4x32xbf16>, vector<32x32xbf16>, vector<4x32xf32> -> vector<4x32xf32>
    %cst_16 = arith.constant dense<0.000000e+00> : vector<4x32xf32>
    %26 = tpu.matmul %10, %8, %cst_16 {dimension_numbers = #tpu.dot_dimension_numbers<[1], [0], [0], [1], [0, 0, 1, 1], [], []>} : vector<4x32xbf16>, vector<32x32xbf16>, vector<4x32xf32> -> vector<4x32xf32>
    %27 = arith.addf %25, %26 : vector<4x32xf32>
    %28 = math.tanh %27 : vector<4x32xf32>
    %c0_17 = arith.constant 0 : index
    %c0_18 = arith.constant 0 : index
    %c0_19 = arith.constant 0 : index
    %29 = vector.load %arg7[%c0_17, %c0_18, %c0_19] : memref<1x4x32xf32, #tpu.memory_space<vmem>>, vector<1x4x32xf32>
    %30 = vector.shape_cast %29 : vector<1x4x32xf32> to vector<4x32xf32>
    %31 = vector.shape_cast %28 : vector<4x32xf32> to vector<1x4x32xf32>
    tpu.vector_store %arg7[%c0_17, %c0_18, %c0_19], %31 {strides = array<i32>} : memref<1x4x32xf32, #tpu.memory_space<vmem>>, vector<1x4x32xf32>,
    %c0_20 = arith.constant 0 : index
    %c0_21 = arith.constant 0 : index
    %c0_22 = arith.constant 0 : index
    %32 = vector.load %arg8[%c0_20, %c0_21, %c0_22] : memref<1x4x8xf32, #tpu.memory_space<vmem>>, vector<1x4x8xf32>
    %33 = vector.shape_cast %32 : vector<1x4x8xf32> to vector<4x8xf32>
    %34 = vector.shape_cast %21 : vector<4x8xf32> to vector<1x4x8xf32>
    tpu.vector_store %arg8[%c0_20, %c0_21, %c0_22], %34 {strides = array<i32>} : memref<1x4x8xf32, #tpu.memory_space<vmem>>, vector<1x4x8xf32>,
    return
  }
  func.func @transform_0(%arg0: i32, %arg1: i32) -> (i32, i32, i32) {
    %c0_i32 = arith.constant 0 : i32
    %c0_i32_0 = arith.constant 0 : i32
    return %arg0, %arg1, %c0_i32 : i32, i32, i32
  }
  func.func @transform_1(%arg0: i32, %arg1: i32) -> (i32, i32, i32) {
    %c0_i32 = arith.constant 0 : i32
    %c0_i32_0 = arith.constant 0 : i32
    %c0_i32_1 = arith.constant 0 : i32
    return %arg0, %c0_i32, %c0_i32_0 : i32, i32, i32
  }
  func.func @transform_2(%arg0: i32, %arg1: i32) -> (i32, i32) {
    %c0_i32 = arith.constant 0 : i32
    %c0_i32_0 = arith.constant 0 : i32
    %c0_i32_1 = arith.constant 0 : i32
    return %c0_i32, %c0_i32_0 : i32, i32
  }
  func.func @transform_3(%arg0: i32, %arg1: i32) -> (i32, i32) {
    %c0_i32 = arith.constant 0 : i32
    %c0_i32_0 = arith.constant 0 : i32
    %c0_i32_1 = arith.constant 0 : i32
    return %c0_i32, %c0_i32_0 : i32, i32
  }
  func.func @transform_4(%arg0: i32, %arg1: i32) -> (i32, i32) {
    %c0_i32 = arith.constant 0 : i32
    %c0_i32_0 = arith.constant 0 : i32
    %c0_i32_1 = arith.constant 0 : i32
    return %c0_i32, %c0_i32_0 : i32, i32
  }
  func.func @transform_5(%arg0: i32, %arg1: i32) -> (i32, i32, i32) {
    %c0_i32 = arith.constant 0 : i32
    %c0_i32_0 = arith.constant 0 : i32
    return %arg0, %arg1, %c0_i32 : i32, i32, i32
  }
  func.func @transform_6(%arg0: i32, %arg1: i32) -> (i32, i32, i32) {
    %c0_i32 = arith.constant 0 : i32
    %c0_i32_0 = arith.constant 0 : i32
    return %arg0, %arg1, %c0_i32 : i32, i32, i32
  }
}

</mosaic_0001>

<bundles_post_ra>
// kernel: tpu_custom_call.1
= control target key start
LH: loop header
LB: loop body
LE: loop exit
PB: predicated region body
PF: predicated region fallthrough
CT: control target
= control target key end

     0   :  { %s1759_s0 = inlined_call_operand.hbm [shape: f32[2,4,32], index: 0, kind: input, shape index: {}]   ;;  %s1760_s1 = inlined_call_operand.hbm [shape: f32[2,8,32], index: 1, kind: input, shape index: {}]   ;;  %s1761_s2 = inlined_call_operand.hbm [shape: bf16[32,32], index: 2, kind: input, shape index: {}]   ;;  %s1762_s3 = inlined_call_operand.hbm [shape: bf16[32,32], index: 3, kind: input, shape index: {}]   ;;  %s1763_s4 = inlined_call_operand.hbm [shape: bf16[32,32], index: 4, kind: input, shape index: {}]   ;;  %s1764_s5 = inlined_call_operand.hbm [shape: f32[2,4,32], index: 5, kind: output, shape index: {0}]   ;;  %s1765_s6 = inlined_call_operand.hbm [shape: f32[2,4,8], index: 6, kind: output, shape index: {1}]  }
   0x1   :  { %1772 = sst [smem:[#allocation22_spill]] %s1759_s0 }
   0x2   :  { %1773 = sst [smem:[#allocation23_spill]] %s1761_s2 }
   0x3   :  { %12 = vsyncpa [#allocation3], 0 }
   0x4   :  { %14 = vsyncpa [#allocation3 + $0x1], 0 }
   0x5   :  { %15 = vsyncpa [#allocation6], 0 }
   0x6   :  { %17 = vsyncpa [#allocation6 + $0x1], 0 }
   0x7   :  { %18 = vsyncpa [#allocation9], 0 }
   0x8   :  { %19 = vsyncpa [#allocation4], 0 }
   0x9   :  { %21 = vsyncpa [#allocation4 + $0x1], 0 }
   0xa   :  { %22 = vsyncpa [#allocation13], 0 }
   0xb   :  { %24 = vsyncpa [#allocation13 + $0x1], 0  ;;  %s1393_s21 = smov 0   ;;  %s1395_s22 = smov 0  }
   0xc   :  { %s1397_s23 = smov 0   ;;  %s1399_s24 = smov 0  }
   0xd   :  { %s1401_s25 = smov 0   ;;  %s1403_s26 = smov 0  }
   0xe LB: > { %1774 = sst [smem:[#allocation20_spill]] %s1325_s21  ;;  %s1424_s27 = sadd.s32 4294967295, %s1345_s26   ;;  %s1345_s26 = sphi %s1403_s26, %s30_s26   ;;  %s1341_s25 = sphi %s1401_s25, %s1802_s25   ;;  %s1337_s24 = sphi %s1399_s24, %s1801_s24   ;;  %s1333_s23 = sphi %s1397_s23, %s1800_s23   ;;  %s1329_s22 = sphi %s1395_s22, %s1799_s22   ;;  %s1325_s21 = sphi %s1393_s21, %s1798_s21  }
   0xf   : > { %s868_s28 = sadd.s32 4294967294, %s1345_s26   ;;  %p64_p0 = scmp.ne.s32.totalorder %s1329_s22, %s1325_s21 }
  0x10   : > { %p1766_p1 = scmp.eq.s32.totalorder %s1424_s27, 0  ;;  %p185_p3 = scmp.eq.s32.totalorder %s868_s28, 1 }
  0x11   : > { %p869_p5 = scmp.ge.s32.totalorder %s1345_s26, 1  ;;  %p220_p7 = scmp.lt.s32.totalorder %s1345_s26, 3 }
  0x12   : > { %p1433_p4 = por %p1766_p1, %p64_p0  ;;  %p1438_p6 = por %p185_p3, %p64_p0 }
  0x13   : > { %p1443_p8 = pnand %p869_p5, %p220_p7  ;;  %s1347_s8 = smov [#allocation7]  }
  0x14   : > { %s1775_s29 = scalar_select %p1433_p4, 1, 0 }
  0x15   : > { %s1776_s30 = scalar_select %p1438_p6, 1, 0 }
  0x16   : > { %s1778_s7 = scalar_select %p1443_p8, 1, 0 }
  0x17   : > { %1777 = sst [smem:[#allocation21_spill]] %s1776_s30  ;;  %s232_s9 = sshll.u32 %s1347_s8, 4  ;;  %s1447_s9 = int_to_ptr.vmem [resolvable:$true] %s232_s9 }
  0x18   : > { %p976_p9 = pneg %p1443_p8  ;;  %s1348_s11 = smov [#allocation8]  }
  0x19   : > { %s245_s12 = sshll.u32 %s1348_s11, 4  ;;  %s1349_s13 = smov [#allocation10]   ;;  %s1458_s12 = int_to_ptr.vmem [resolvable:$true] %s245_s12 }
  0x1a   : > { %p1454_p11 = pnand %p976_p9, %p1766_p1  ;;  %s1460_s14 = sshll.u32 %s1349_s13, 4  ;;  %s259_s14 = int_to_ptr.vmem [resolvable:$true] %s1460_s14 }
  0x1b   : > { %s1780_s2 = sld [smem:[#allocation23_spill]] }
  0x1c   : > { %p1470_p13 = pneg %p1454_p11 }
  0x21   : > { %s1075_s17 = scalar_lea.hbm %s1780_s2, 256 }
  0x22   : > { %p1076_p12 = scmp.ne.s32.totalorder %s1780_s2, %s1075_s17  ;;  %p1082_p5 = scmp.lt.u32.totalorder %s1075_s17, %s1780_s2 }
  0x24   : > { %p1078_p0 = pnand %p1470_p13, %p1076_p12 }
  0x26   : > { %p1079_p3 = pneg %p1078_p0 }
  0x28   : > { %p1084_p7 = pnand %p1082_p5, %p1079_p3 }
  0x2a   : > { %1087 = shalt.err (!%p1084_p7)
}
  0x2b   : > { %s1088_s11 = scalar_lea.vmem %s1447_s9, 256  ;;  %p1096_p2 = scmp.lt.s32.totalorder %s1447_s9, %s1447_s9 }
  0x2c   : > { %p1089_p9 = scmp.ne.s32.totalorder %s1447_s9, %s1088_s11  ;;  %p1097_p6 = scmp.lt.s32.totalorder %s1088_s11, %s1088_s11 }
  0x2e   : > { %p1091_p10 = pnand %p1089_p9, %p1470_p13  ;;  %p1098_p12 = por %p1097_p6, %p1096_p2 }
  0x30   : > { %p1092_p1 = pneg %p1091_p10 }
  0x32   : > { %p1099_p0 = pnand %p1098_p12, %p1092_p1 }
  0x34   : > { %1102 = shalt.err (!%p1099_p0)
}
  0x35   : > { %s1350_s13 = smov 64   ;;  %s1351_s15 = smov 4  }
  0x36   : > { %979 = dma.hbm_to_vmem [thread:$0]  (!%p1454_p11), %s1780_s2, 256, %s1447_s9, [#allocation6], %s1350_s13, %s1350_s13, %s1351_s15  }
  0x37   : > { %s1103_s28 = scalar_lea.hbm %s1762_s3, 256 }
  0x38   : > { %p1104_p1 = scmp.ne.s32.totalorder %s1762_s3, %s1103_s28  ;;  %p1110_p10 = scmp.lt.u32.totalorder %s1103_s28, %s1762_s3 }
  0x3a   : > { %p1106_p2 = pnand %p1104_p1, %p1470_p13 }
  0x3c   : > { %p1107_p6 = pneg %p1106_p2 }
  0x3e   : > { %p1112_p3 = pnand %p1110_p10, %p1107_p6 }
  0x40   : > { %1115 = shalt.err (!%p1112_p3)
}
  0x41   : > { %s1116_s9 = scalar_lea.vmem %s1458_s12, 256  ;;  %p1124_p12 = scmp.lt.s32.totalorder %s1458_s12, %s1458_s12 }
  0x42   : > { %p1117_p5 = scmp.ne.s32.totalorder %s1458_s12, %s1116_s9  ;;  %p1125_p0 = scmp.lt.s32.totalorder %s1116_s9, %s1116_s9 }
  0x44   : > { %p1119_p7 = pnand %p1117_p5, %p1470_p13  ;;  %p1126_p1 = por %p1125_p0, %p1124_p12 }
  0x46   : > { %p1120_p9 = pneg %p1119_p7 }
  0x48   : > { %p1127_p2 = pnand %p1126_p1, %p1120_p9 }
  0x4a   : > { %1130 = shalt.err (!%p1127_p2)
}
  0x4b   : > { %982 = dma.hbm_to_vmem [thread:$0]  (!%p1454_p11), %s1762_s3, 256, %s1458_s12, [#allocation9], %s1350_s13, %s1350_s13, %s1351_s15  }
  0x4c   : > { %s1131_s18 = scalar_lea.hbm %s1763_s4, 256 }
  0x4d   : > { %p1132_p6 = scmp.ne.s32.totalorder %s1763_s4, %s1131_s18  ;;  %p1138_p5 = scmp.lt.u32.totalorder %s1131_s18, %s1763_s4 }
  0x4f   : > { %p1134_p10 = pnand %p1132_p6, %p1470_p13 }
  0x51   : > { %p1135_p3 = pneg %p1134_p10 }
  0x53   : > { %p1140_p7 = pnand %p1138_p5, %p1135_p3 }
  0x55   : > { %1143 = shalt.err (!%p1140_p7)
}
  0x56   : > { %s1144_s9 = scalar_lea.vmem %s259_s14, 256  ;;  %p1152_p1 = scmp.lt.s32.totalorder %s259_s14, %s259_s14 }
  0x57   : > { %p1145_p9 = scmp.ne.s32.totalorder %s259_s14, %s1144_s9  ;;  %p1153_p2 = scmp.lt.s32.totalorder %s1144_s9, %s1144_s9 }
  0x59   : > { %p1147_p12 = pnand %p1145_p9, %p1470_p13  ;;  %p1154_p4 = por %p1153_p2, %p1152_p1 }
  0x5b   : > { %p1148_p0 = pneg %p1147_p12 }
  0x5d   : > { %p1155_p8 = pnand %p1154_p4, %p1148_p0 }
  0x5f   : > { %1158 = shalt.err (!%p1155_p8)
}
  0x60   : > { %985 = dma.hbm_to_vmem [thread:$0]  (!%p1454_p11), %s1763_s4, 256, %s259_s14, [#allocation9], %s1350_s13, %s1350_s13, %s1351_s15  }
  0x61   : > { %s51_s20 = sadd.s32 1, %s1333_s23  ;;  %s42_s10 = sadd.s32 1, %s1341_s25 }
  0x62   : > { %p58_p4 = scmp.ne.s32.totalorder %s1333_s23, %s1329_s22  ;;  %p44_p8 = scmp.ge.s32.totalorder %s42_s10, 2 }
  0x63   : > { %p59_p13 = scmp.eq.s32.totalorder %s1345_s26, 0  ;;  %p1782_p6 = scmp.eq.s32.totalorder %s1424_s27, 1 }
  0x64   : > { %p1003_p3 = scmp.lt.s32.totalorder %s1345_s26, 2  ;;  %s1804_s10 = smov (%p44_p8, %s42_s10), 0 }
  0x65   : > { %p1549_p10 = por %p1782_p6, %p58_p4  ;;  %p60_p5 = por %p59_p13, %p58_p4 }
  0x66   : > { %s1557_s16 = sand.u32 1, %s1333_s23   ;;  %s46_s14 = ssub.s32 %s1341_s25, %s1804_s10 }
  0x67   : > { %s1783_s30 = scalar_select %p1549_p10, 1, 0 }
  0x68   : > { %p49_p11 = scmp.eq.s32.totalorder %s46_s14, 0  ;;  %s874_s13 = sshll.u32 %s1557_s16, 2 }
  0x69   : > { %s875_s15 = sshll.u32 %s1341_s25, 6  ;;  %s1784_s0 = sld [smem:[#allocation22_spill]] }
  0x6a   : > { %s1564_s17 = scalar_select %p49_p11, %s1333_s23, %s51_s20  }
  0x6b   : > { %s276_s8 = scalar_lea.vmem [#allocation2], %s874_s13  ;;  %p1575_p7 = pnand %p1003_p3, %p60_p5 }
  0x6c   : > { %s284_s11 = sshll.u32 %s276_s8, 4  ;;  %s876_s21 = sshll.u32 %s1557_s16, 3  ;;  %s1571_s11 = int_to_ptr.vmem [resolvable:$true] %s284_s11 }
  0x6d   : > { %s273_s20 = scalar_lea.sflag [#allocation3], %s1557_s16  ;;  %p1161_p12 = pneg %p1575_p7 }
  0x6f   : > { %s1569_s28 = scalar_lea.hbm %s1784_s0, %s875_s15  ;;  %s1164_s18 = scalar_lea.hbm %s1784_s0, 128 }
  0x70   : > { %s1159_s14 = scalar_lea.hbm %s1569_s28, 64  ;;  %p1165_p2 = scmp.lt.u32.totalorder %s1569_s28, %s1784_s0 }
  0x71   : > { %p1160_p9 = scmp.ne.s32.totalorder %s1569_s28, %s1159_s14  ;;  %p1166_p4 = scmp.lt.u32.totalorder %s1164_s18, %s1159_s14 }
  0x72   : > { %p1168_p13 = scmp.lt.u32.totalorder %s1159_s14, %s1569_s28 }
  0x73   : > { %p1162_p0 = pnand %p1161_p12, %p1160_p9  ;;  %p1167_p8 = por %p1166_p4, %p1165_p2 }
  0x75   : > { %p1163_p1 = pneg %p1162_p0  ;;  %p1169_p6 = por %p1168_p13, %p1167_p8 }
  0x77   : > { %p1170_p3 = pnand %p1169_p6, %p1163_p1 }
  0x79   : > { %1173 = shalt.err (!%p1170_p3)
}
  0x7a   : > { %s1174_s12 = scalar_lea.vmem %s1571_s11, 64  ;;  %s1352_s13 = smov [#allocation2]  }
  0x7b   : > { %p1175_p5 = scmp.ne.s32.totalorder %s1571_s11, %s1174_s12  ;;  %s1179_s15 = sshll.u32 %s1352_s13, 4  ;;  %s1180_s15 = int_to_ptr.vmem [resolvable:$false] %s1179_s15 }
  0x7c   : > { %s1181_s19 = scalar_lea.vmem %s1180_s15, 128  ;;  %p1182_p0 = scmp.lt.s32.totalorder %s1571_s11, %s1180_s15 }
  0x7d   : > { %p1177_p11 = pnand %p1175_p5, %p1161_p12  ;;  %p1183_p2 = scmp.lt.s32.totalorder %s1181_s19, %s1174_s12 }
  0x7f   : > { %p1178_p9 = pneg %p1177_p11  ;;  %p1184_p4 = por %p1183_p2, %p1182_p0 }
  0x81   : > { %p1185_p8 = pnand %p1184_p4, %p1178_p9 }
  0x83   : > { %1188 = shalt.err (!%p1185_p8)
}
  0x84   : > { %989 = dma.hbm_to_vmem [thread:$0]  (!%p1575_p7), %s1569_s28, 64, %s1571_s11, %s273_s20  }
  0x85   : > { %s877_s14 = sshll.u32 %s1341_s25, 7  ;;  %s295_s12 = scalar_lea.vmem [#allocation5], %s876_s21 }
  0x86   : > { %s1611_s13 = scalar_lea.hbm %s1760_s1, %s877_s14  ;;  %s302_s15 = sshll.u32 %s295_s12, 4  ;;  %s303_s15 = int_to_ptr.vmem [resolvable:$true] %s302_s15 }
  0x87   : > { %s1786_s19 = sand.u32 1, %s1345_s26   ;;  %s1189_s2 = scalar_lea.hbm %s1611_s13, 128 }
  0x88   : > { %s292_s0 = scalar_lea.sflag [#allocation6], %s1786_s19  ;;  %p1190_p1 = scmp.ne.s32.totalorder %s1611_s13, %s1189_s2 }
  0x89   : > { %s1194_s20 = scalar_lea.hbm %s1760_s1, 256  ;;  %p1195_p3 = scmp.lt.u32.totalorder %s1611_s13, %s1760_s1 }
  0x8a   : > { %p1192_p13 = pnand %p1190_p1, %p1161_p12  ;;  %p1196_p5 = scmp.lt.u32.totalorder %s1194_s20, %s1189_s2 }
  0x8b   : > { %p1198_p9 = scmp.lt.u32.totalorder %s1189_s2, %s1611_s13 }
  0x8c   : > { %p1193_p6 = pneg %p1192_p13  ;;  %p1197_p11 = por %p1196_p5, %p1195_p3 }
  0x8e   : > { %p1199_p0 = por %p1198_p9, %p1197_p11 }
  0x90   : > { %p1200_p2 = pnand %p1199_p0, %p1193_p6 }
  0x92   : > { %1203 = shalt.err (!%p1200_p2)
}
  0x93   : > { %s1204_s21 = scalar_lea.vmem %s303_s15, 128  ;;  %s1353_s18 = smov [#allocation5]  }
  0x94   : > { %p1205_p4 = scmp.ne.s32.totalorder %s303_s15, %s1204_s21  ;;  %s1209_s8 = sshll.u32 %s1353_s18, 4  ;;  %s1210_s8 = int_to_ptr.vmem [resolvable:$false] %s1209_s8 }
  0x95   : > { %s1211_s12 = scalar_lea.vmem %s1210_s8, 256  ;;  %p1212_p13 = scmp.lt.s32.totalorder %s303_s15, %s1210_s8 }
  0x96   : > { %p1207_p8 = pnand %p1205_p4, %p1161_p12  ;;  %p1213_p10 = scmp.lt.s32.totalorder %s1211_s12, %s1204_s21 }
  0x98   : > { %p1208_p1 = pneg %p1207_p8  ;;  %p1214_p3 = por %p1213_p10, %p1212_p13 }
  0x9a   : > { %p1215_p5 = pnand %p1214_p3, %p1208_p1 }
  0x9c   : > { %1218 = shalt.err (!%p1215_p5)
}
  0x9d   : > { %992 = dma.hbm_to_vmem [thread:$0]  (!%p1575_p7), %s1611_s13, 128, %s303_s15, %s292_s0  }
  0x9e   : > { %p1787_p6 = scmp.ne.s32.totalorder %s1778_s7, 0 }
  0x9f   : > { %s1639_s2 = sand.u32 (!%p1787_p6), 1, %s1329_s22   ;;  %p1788_p10 = scmp.ne.s32.totalorder (!%p1787_p6), %s1775_s29, 0 }
  0xa0   : > { %311 = sbr.rel (%p1787_p6) target bundleno = 1380 (0x564), region = 40  ;;  %s1642_s19 = sshll.u32 (!%p1787_p6), %s1639_s2, 2 }
  0xa1   : > { %s314_s28 = scalar_lea.sflag (!%p1787_p6), [#allocation3], %s1639_s2  ;;  %s317_s11 = scalar_lea.vmem (!%p1787_p6), [#allocation2], %s1642_s19 }
  0xa7   : > { %1300 = dma.done.wait (%p1788_p10), %s314_s28, 64  }
  0xa8   : > { %1302 = vsyncadd (%p1788_p10), %s314_s28, 4294967232  ;;  %s322_s0 = sand.u32 1, %s1424_s27   ;;  %s880_s7 = sshll.u32 %s1639_s2, 3 }
  0xa9   : > { %s323_s9 = scalar_lea.sflag [#allocation6], %s322_s0  ;;  %s326_s13 = scalar_lea.vmem [#allocation5], %s880_s7 }
  0xaa   : > { %1304 = dma.done.wait (%p1788_p10), %s323_s9, 128  }
  0xab   : > { %1306 = vsyncadd (%p1788_p10), %s323_s9, 4294967168  ;;  %p1789_p7 = scmp.eq.s32.totalorder %s1424_s27, 0 }
  0xad   : > { %1308 = dma.done.wait (%p1789_p7), [#allocation6], 256   ;;  %p1790_p12 = pmov %p1789_p7 }
  0xae   : > { %p1791_p11 = pmov %p1789_p7 }
  0xaf   : > { %1310 = vsyncadd (%p1790_p12), [#allocation6], 4294967040 }
  0xb0   : > { %1312 = dma.done.wait (%p1791_p11), [#allocation9], 512   ;;  %p1792_p9 = pmov %p1789_p7 }
  0xb1   : > { %v1354_v0 = vmov 0.0   ;;  %vm1355_vm0 = vmmov 0   ;;  %v1063_v1 = vld [vmem:[#allocation7] sm:$0xff]   ;;  %v1064_v2 = vld [vmem:[#allocation7 + $0x8] sm:$0xff]   ;;  %vm406_vm1 = vcmask 261120   ;;  %v380_v4 = vld [vmem:[%s326_s13] sm:$0xff] }
  0xb2   : > { %1314 = vsyncadd (%p1792_p9), [#allocation9], 4294966784  ;;  %916 = vmatprep.subr.bf16.mxu0 %v1354_v0  ;;  %920 = vmatprep.mubr.msk.bf16.mxu0 %vm1355_vm0, %v1354_v0  ;;  %v378_v3 = vld [vmem:[%s317_s11] sm:$0xf]  ;;  %v381_v5 = vpack.c.bf16 %v380_v4, %v380_v4  ;;  %v1065_v9 = vld [vmem:[#allocation10] sm:$0xff]   ;;  %vm497_vm2 = vcmask 60416  }
  0xb3   : > { %924 = vmatprep.subr.bf16.mxu1 %v1354_v0  ;;  %926 = vmatprep.mubr.msk.bf16.mxu1 %vm1355_vm0, %v1354_v0  ;;  %v379_v6 = vpack.c.bf16 %v378_v3, %v378_v3  ;;  %v1066_v14 = vld [vmem:[#allocation10 + $0x8] sm:$0xff]   ;;  %vm514_vm3 = vcmask 1043456   ;;  %v1067_v26 = vld [vmem:[#allocation8] sm:$0xff]   ;;  %v1068_v27 = vld [vmem:[#allocation8 + $0x8] sm:$0xff]   ;;  %vm510_vm4 = vcmask 64512   ;;  %s376_s27 = scalar_lea.vmem [#allocation12], %s1642_s19 }
  0xb4   : > { %917 = vmatpush3.bf16.msra.mxu0 %v1063_v1  ;;  %v455_v7 = vsel %vm406_vm1, %v381_v5, 0  ;;  %v515_v25 = vsel %vm514_vm3, %v381_v5, 0  ;;  %s899_s29 = sshll.u32 %s1337_s24, 6  ;;  %s703_s14 = sshll.u32 %s376_s27, 4  ;;  %s704_s14 = int_to_ptr.vmem [resolvable:$true] %s703_s14 }
  0xb5   : > { %918 = vmatprep.subr.bf16.mxu0 %v1354_v0  ;;  %925 = vmatpush3.bf16.xpose.msra.mxu1 %v455_v7  ;;  %s1684_s16 = scalar_lea.hbm %s1765_s6, %s899_s29  ;;  %s675_s21 = scalar_lea.sflag [#allocation13], %s1639_s2 }
  0xb6   : > { %936 = vmatprep.subr.bf16.mxu1 %v1354_v0  ;;  %s1219_s18 = scalar_lea.vmem %s704_s14, 64  ;;  %p1793_p2 = scmp.ne.s32.totalorder %s1783_s30, 0 }
  0xb7   : > { %p1220_p0 = scmp.ne.s32.totalorder %s704_s14, %s1219_s18  ;;  %s1356_s8 = smov [#allocation12]  }
  0xb8   : > { %919 = vmatpush3.bf16.msra.mxu0 %v1064_v2  ;;  %s1223_s12 = sshll.u32 %s1356_s8, 4  ;;  %s1224_s12 = int_to_ptr.vmem [resolvable:$false] %s1223_s12 }
  0xb9   : > { %930 = vmatprep.subr.bf16.mxu0 %v1354_v0  ;;  %p1221_p4 = pnand %p1220_p0, %p1793_p2  ;;  %s1225_s28 = scalar_lea.vmem %s1224_s12, 128 }
  0xba   : > { %p1226_p1 = scmp.lt.s32.totalorder %s704_s14, %s1224_s12  ;;  %p1227_p13 = scmp.lt.s32.totalorder %s1225_s28, %s1219_s18 }
  0xbb   : > { %921 = vmatmul.mubr.msk.bf16.vlgmr.msra.gmra.mrb[0].mxu0 %vm406_vm1, %v379_v6  ;;  %p1222_p8 = pneg %p1221_p4 }
  0xbc   : > { %932 = vmatprep.mubr.msk.bf16.mxu0 %vm1355_vm0, %v1354_v0  ;;  %931 = vmatpush3.bf16.msra.mxu0 %v515_v25  ;;  %p1228_p3 = por %p1227_p13, %p1226_p1 }
  0xbe   : > { %p1229_p5 = pnand %p1228_p3, %p1222_p8 }
 0x18e   : > { %v444_v8 = vpop.f32.mrb[0].mxu0 }
 0x18f   : > { %v450_v10 = vpack.c.bf16 %v444_v8, %v444_v8  ;;  %v922_v11 = vpop.f32.mrb[1].mxu0 }
 0x190   : > { %v447_v12 = vpop.f32.mrb[2].mxu0 }
 0x191   : > { %v923_v13 = vpop.f32.mrb[3].mxu0  ;;  %927 = vmatmul.mubr.msk.bf16.vlgmr.msra.gmra.mrb[0].mxu1 %vm406_vm1, %v450_v10 }
 0x192   : > { %937 = vmatpush3.bf16.msra.mxu1 %v1065_v9  ;;  %940 = vmatprep.mubr.msk.bf16.mxu1 %vm1355_vm0, %v1354_v0 }
 0x193   : > { %938 = vmatprep.subr.bf16.mxu1 %v1354_v0 }
 0x196   : > { %939 = vmatpush3.bf16.msra.mxu1 %v1066_v14 }
 0x197   : > { %944 = vmatprep.subr.bf16.mxu1 %v1354_v0 }
 0x199   : > { %941 = vmatmul.mubr.msk.bf16.vlgmr.msra.gmra.mrb[4].mxu1 %vm406_vm1, %v450_v10 }
 0x19a   : > { %948 = vmatprep.mubr.msk.bf16.mxu1 %vm1355_vm0, %v1354_v0  ;;  %945 = vmatpush3.bf16.msra.mxu1 %v1067_v26 }
 0x19b   : > { %946 = vmatprep.subr.bf16.mxu1 %v1354_v0 }
 0x19e   : > { %947 = vmatpush3.bf16.msra.mxu1 %v1068_v27 }
 0x264   : > { %v491_v15 = vpop.f32.mrb[0].mxu1 }
 0x265   : > { %v928_v16 = vpop.f32.mrb[1].mxu1  ;;  %v498_v17 = vsel %vm497_vm2, %v491_v15, -inf }
 0x266   : > { %499 = vmax.xlane.f32.xlu0 %v498_v17  ;;  %v494_v18 = vpop.f32.mrb[2].mxu1 }
 0x267   : > { %v929_v19 = vpop.f32.mrb[3].mxu1 }
 0x2f3   : > { %v500_v20 = vpop.xlane.xlu0 %499 }
 0x2f4   : > { %v501_v21 = vsub.f32 %v491_v15, %v500_v20 }
 0x2f6   : > { %v502_v22 = vmul.f32 1.442695, %v501_v21 }
 0x2f8   : > { %1069 = vpow2.f32 %v502_v22 }
 0x302   : > { %v1070_v23 = vpop.eup %1069 }
 0x303   : > { %v504_v24 = vsel %vm497_vm2, %v1070_v23, 0.0 }
 0x304   : > { %505 = vadd.xlane.f32.xlu0 %v504_v24 }
 0x391   : > { %v506_v28 = vpop.xlane.xlu0 %505 }
 0x392   : > { %1071 = vrcp.f32 %v506_v28 }
 0x39c   : > { %v1072_v29 = vpop.eup %1071 }
 0x39d   : > { %v508_v30 = vmul.f32 %v1072_v29, %v1070_v23 }
 0x39f   : > { %v509_v31 = vpack.c.bf16 %v508_v30, %v508_v30  ;;  %668 = vst.msk [vmem:[%s376_s27] sm:$0xf] %vm497_vm2, %v508_v30 }
 0x3a1   : > { %933 = vmatmul.mubr.msk.bf16.vlgmr.msra.gmra.mrb[4].mxu0 %vm510_vm4, %v509_v31 }
 0x474   : > { %v551_v32 = vpop.f32.mrb[4].mxu0 }
 0x475   : > { %v557_v33 = vpack.c.bf16 %v551_v32, %v551_v32  ;;  %v934_v34 = vpop.f32.mrb[5].mxu0 }
 0x476   : > { %v554_v35 = vpop.f32.mrb[6].mxu0 }
 0x477   : > { %v935_v36 = vpop.f32.mrb[7].mxu0  ;;  %949 = vmatmul.mubr.msk.bf16.vlgmr.msra.gmra.mrb[4].mxu1 %vm406_vm1, %v557_v33 }
 0x478   : > { %1232 = shalt.err (!%p1229_p5)
}
 0x479   : > { %s1233_s11 = scalar_lea.hbm %s1684_s16, 64  ;;  %s1237_s9 = scalar_lea.hbm %s1765_s6, 128 }
 0x47a   : > { %p1234_p6 = scmp.ne.s32.totalorder %s1684_s16, %s1233_s11  ;;  %p1238_p12 = scmp.lt.u32.totalorder %s1684_s16, %s1765_s6 }
 0x47b   : > { %p1239_p11 = scmp.lt.u32.totalorder %s1237_s9, %s1233_s11  ;;  %p1241_p0 = scmp.lt.u32.totalorder %s1233_s11, %s1684_s16 }
 0x47c   : > { %p1235_p10 = pnand %p1234_p6, %p1793_p2 }
 0x47d   : > { %p1240_p9 = por %p1239_p11, %p1238_p12 }
 0x47e   : > { %p1236_p7 = pneg %p1235_p10 }
 0x47f   : > { %p1242_p4 = por %p1241_p0, %p1240_p9 }
 0x481   : > { %p1243_p8 = pnand %p1242_p4, %p1236_p7 }
 0x483   : > { %1246 = shalt.err (!%p1243_p8)
}
 0x484   : > { %973 = dma.vmem_to_hbm [thread:$0]  (%p1793_p2), %s704_s14, 64, %s1684_s16, %s675_s21   ;;  %vm666_vm5 = vcmask 257024  }
 0x485   : > { %s369_s15 = scalar_lea.vmem [#allocation11], %s1642_s19  ;;  %s1710_s12 = scalar_lea.hbm %s1764_s5, %s899_s29 }
 0x486   : > { %s689_s20 = sshll.u32 %s369_s15, 4  ;;  %s670_s16 = scalar_lea.sflag [#allocation4], %s1639_s2  ;;  %s1712_s20 = int_to_ptr.vmem [resolvable:$true] %s689_s20 }
 0x487   : > { %s1247_s14 = scalar_lea.vmem %s1712_s20, 64  ;;  %s1357_s19 = smov [#allocation11]  }
 0x488   : > { %p1248_p1 = scmp.ne.s32.totalorder %s1712_s20, %s1247_s14  ;;  %s1251_s24 = sshll.u32 %s1357_s19, 4  ;;  %s1252_s24 = int_to_ptr.vmem [resolvable:$false] %s1251_s24 }
 0x489   : > { %s1253_s21 = scalar_lea.vmem %s1252_s24, 128  ;;  %p1254_p5 = scmp.lt.s32.totalorder %s1712_s20, %s1252_s24 }
 0x48a   : > { %p1249_p13 = pnand %p1248_p1, %p1793_p2  ;;  %p1255_p6 = scmp.lt.s32.totalorder %s1253_s21, %s1247_s14 }
 0x48c   : > { %p1250_p3 = pneg %p1249_p13  ;;  %p1256_p10 = por %p1255_p6, %p1254_p5 }
 0x48e   : > { %p1257_p7 = pnand %p1256_p10, %p1250_p3 }
 0x54a   : > { %v659_v37 = vpop.f32.mrb[4].mxu1 }
 0x54b   : > { %1073 = vtanh.f32 %v659_v37  ;;  %v950_v38 = vpop.f32.mrb[5].mxu1 }
 0x54c   : > { %v662_v39 = vpop.f32.mrb[6].mxu1 }
 0x54d   : > { %v951_v40 = vpop.f32.mrb[7].mxu1 }
 0x555   : > { %v1074_v41 = vpop.eup %1073 }
 0x556   : > { %667 = vst.msk [vmem:[%s369_s15] sm:$0xf] %vm666_vm5, %v1074_v41 }
 0x557   : > { %1260 = shalt.err (!%p1257_p7)
}
 0x558   : > { %s1261_s2 = scalar_lea.hbm %s1710_s12, 64  ;;  %s1265_s11 = scalar_lea.hbm %s1764_s5, 128 }
 0x559   : > { %p1262_p12 = scmp.ne.s32.totalorder %s1710_s12, %s1261_s2  ;;  %p1266_p0 = scmp.lt.u32.totalorder %s1710_s12, %s1764_s5 }
 0x55a   : > { %p1267_p4 = scmp.lt.u32.totalorder %s1265_s11, %s1261_s2  ;;  %p1269_p1 = scmp.lt.u32.totalorder %s1261_s2, %s1710_s12 }
 0x55b   : > { %p1263_p11 = pnand %p1262_p12, %p1793_p2 }
 0x55c   : > { %p1268_p8 = por %p1267_p4, %p1266_p0 }
 0x55d   : > { %p1264_p9 = pneg %p1263_p11 }
 0x55e   : > { %p1270_p13 = por %p1269_p1, %p1268_p8 }
 0x560   : > { %p1271_p3 = pnand %p1270_p13, %p1264_p9 }
 0x562   : > { %1274 = shalt.err (!%p1271_p3)
}
 0x563   : > { %972 = dma.vmem_to_hbm [thread:$0]  (%p1793_p2), %s1712_s20, 64, %s1710_s12, %s670_s16  }
 0x564 PF: > { %s1794_s9 = sld [smem:[#allocation20_spill]]  ;;  %s1795_s13 = sld [smem:[#allocation21_spill]] }
 0x565   : > { %p1797_p6 = scmp.ge.s32.totalorder %s1345_s26, 2 }
 0x56a   : > { %s715_s27 = sand.u32 1, %s1794_s9   ;;  %p1796_p5 = scmp.ne.s32.totalorder %s1795_s13, 0 }
 0x56b   : > { %s716_s15 = scalar_lea.sflag [#allocation4], %s715_s27 }
 0x56c   : > { %p994_p10 = pnand %p1797_p6, %p1796_p5 }
 0x56e   : > { %1316 = dma.done.wait (!%p994_p10), %s716_s15, 64  }
 0x56f   : > { %1318 = vsyncadd (!%p994_p10), %s716_s15, 4294967232  ;;  %s725_s18 = scalar_lea.sflag [#allocation13], %s715_s27 }
 0x570   : > { %1320 = dma.done.wait (!%p994_p10), %s725_s18, 64  }
 0x571   : > { %1322 = vsyncadd (!%p994_p10), %s725_s18, 4294967232  ;;  %s30_s26 = sadd.s32 1, %s1345_s26   ;;  %s1798_s21 = smov %s1329_s22 }
 0x572   : > { %p27_p7 = scmp.ge.s32.totalorder %s30_s26, 4   ;;  %s1799_s22 = smov %s1333_s23 }
 0x573   : > { %s1800_s23 = smov %s1564_s17  ;;  %s1801_s24 = smov %s1341_s25 }
 0x574   : > { %s1802_s25 = smov %s1804_s10  ;;  %29 = sbr.rel (!%p27_p7) target bundleno = 14 (0xe), region = 127 }
 0x57b   :  { %730 = vsyncpa [#allocation3], 1 }
 0x57c   :  { %732 = vsyncpa [#allocation3 + $0x1], 1 }
 0x57d   :  { %733 = vsyncpa [#allocation6], 1 }
 0x57e   :  { %735 = vsyncpa [#allocation6 + $0x1], 1 }
 0x57f   :  { %736 = vsyncpa [#allocation9], 1 }
 0x580   :  { %737 = vsyncpa [#allocation4], 1 }
 0x581   :  { %739 = vsyncpa [#allocation4 + $0x1], 1 }
 0x582   :  { %740 = vsyncpa [#allocation13], 1 }
 0x583   :  { %742 = vsyncpa [#allocation13 + $0x1], 1 }

</bundles_post_ra>
